<compile_context>
chip_gen: v5e
topology: v5e:2x2
jax: 0.10.0
libtpu: 0.0.40
codegen_flags: <defaults>
</compile_context>

<pallas_src>
import jax
import jax.numpy as jnp
from jax.experimental import pallas as pl
from jax.experimental.pallas import tpu as pltpu

PAD = 0            # dict.PAD in the reference codebase
TAU_INVERSE = 0.5
MAX_PROB = 0.9
MSE_STRENGTH = 1.0
PRETRAIN = 20000

# one-time module-level feature check (never probed / synced in the hot path)
try:
    _CONST_PIPELINE_MODE = pl.Buffered(1)   # single-buffer grid-invariant blocks
except Exception:                           # older jax without pipeline_mode support
    _CONST_PIPELINE_MODE = None


def _criterion_emb_kernel(scalars_ref,                    # SMEM prefetch: [flag, n_valid]
                          out_h_ref, logits_ref,
                          w1t_ref, b1_ref, w2t_ref, b2_ref, emb_tbl_ref,
                          tgt_ref, loss_ref):
    flag = scalars_ref[0]        # 1 once updates >= pretrain
    n_valid = scalars_ref[1]     # number of real (non-padded) rows

    out_h = out_h_ref[...]                        # (TN, H) native dtype
    logits = logits_ref[...].astype(jnp.float32)  # (TN, V) f32
    tgt = tgt_ref[...]                            # (TN, 1) int32
    mm_dtype = out_h.dtype
    tn, V = logits.shape

    col = jax.lax.broadcasted_iota(jnp.int32, (tn, V), 1)
    is_tgt = col == tgt
    onehot = is_tgt.astype(jnp.float32).astype(mm_dtype)

    row = jax.lax.broadcasted_iota(jnp.int32, (tn, 1), 0) + pl.program_id(0) * tn
    valid = row < n_valid                                     # mask for padded rows
    valid_f = valid.astype(jnp.float32)
    row_w = (valid & (tgt != PAD)).astype(jnp.float32)        # CE weight (weight[PAD]=0)

    # ---- MXU: matmuls in the activations' native dtype, f32 accumulation ----
    y2 = (jnp.dot(out_h, w1t_ref[...], preferred_element_type=jnp.float32)
          + b1_ref[...].astype(jnp.float32))                  # (TN, V) f32
    # embedding row gather fused as a one-hot matmul (exact; MXU has slack here)
    emb_rows = jnp.dot(onehot, emb_tbl_ref[...],
                       preferred_element_type=jnp.float32).astype(mm_dtype)
    emb = (jnp.dot(emb_rows, w2t_ref[...], preferred_element_type=jnp.float32)
           + b2_ref[...].astype(jnp.float32))
    emb = jnp.maximum(emb, 0.0)                               # relu, (TN, V) f32

    # ---- per-row statistics; no full-vocab log-prob / prob tensors built ----
    m_y2 = jnp.max(y2, axis=-1, keepdims=True)
    m_emb = jnp.max(emb, axis=-1, keepdims=True)
    m_lg = jnp.max(logits, axis=-1, keepdims=True)

    s_y2 = y2 - m_y2
    e_low = jnp.exp(s_y2 * TAU_INVERSE)          # numerator of softmax(y2 * tau)
    if TAU_INVERSE == 0.5:
        e_y2 = e_low * e_low                     # exp(s) = exp(s/2)^2 : VALU, saves an EUP pass
    else:
        e_y2 = jnp.exp(s_y2)
    e_emb = jnp.exp(emb - m_emb)
    e_lg = jnp.exp(logits - m_lg)

    z_y2 = jnp.sum(e_y2, axis=-1, keepdims=True)
    z_low = jnp.sum(e_low, axis=-1, keepdims=True)
    z_emb = jnp.sum(e_emb, axis=-1, keepdims=True)
    z_lg = jnp.sum(e_lg, axis=-1, keepdims=True)
    logz_y2 = jnp.log(z_y2)
    logz_emb = jnp.log(z_emb)
    logz_lg = jnp.log(z_lg)

    # target gathers via masked row-sum (no f32 one-hot product with logp tensors)
    y2_t = jnp.sum(jnp.where(is_tgt, y2, 0.0), axis=-1, keepdims=True)
    lg_t = jnp.sum(jnp.where(is_tgt, logits, 0.0), axis=-1, keepdims=True)
    lp_y2_t = (y2_t - m_y2) - logz_y2            # log softmax(y2)[target]
    lp_lg_t = (lg_t - m_lg) - logz_lg            # log softmax(logits)[target]

    # weighted, sum-reduced cross entropies (size_average=False, weight[PAD]=0)
    ce_logits = jnp.sum(row_w * (-lp_lg_t))
    ce_y2 = jnp.sum(row_w * (-lp_y2_t))

    # mask: target attains the row max of y2
    # (== argmax(softmax(y2*tau)) == target, except on exact f32 ties)
    mask = (valid & (y2_t >= m_y2)).astype(jnp.float32)

    # xent(emb, softmax(y2*tau)*mask), row-factored:
    #   sum_v logp_emb * olp = (sum_v emb * e_low)/Z_low - m_emb - logZ_emb
    dot_emb_low = jnp.sum(emb * e_low, axis=-1, keepdims=True)
    xent_rows = dot_emb_low / z_low - m_emb - logz_emb
    xent_emb_out_low = -jnp.sum(mask * xent_rows)

    # | softmax(y2)[target] - max_prob |
    p_t = jnp.exp(lp_y2_t)
    mse_emb = jnp.sum(valid_f * jnp.abs(p_t - MAX_PROB))

    loss_ref[0, 0] = ce_logits + ce_y2 + xent_emb_out_low + MSE_STRENGTH * mse_emb

    # extra term only once updates >= pretrain:
    #   sum_v logp_logits * emb_prob = (sum_v logits * e_emb)/Z_emb - m_lg - logZ_lg
    @pl.when(flag != 0)
    def _():
        dot_lg_emb = jnp.sum(logits * e_emb, axis=-1, keepdims=True)
        extra_rows = dot_lg_emb / z_emb - m_lg - logz_lg
        loss_ref[0, 0] = loss_ref[0, 0] - jnp.sum(valid_f * extra_rows)


def _round_up(x, m):
    return ((x + m - 1) // m) * m


def _vmem_capacity_bytes():
    try:
        return int(pltpu.get_tpu_info().vmem_capacity_bytes)
    except Exception:
        return 64 << 20   # conservative default (v7x per-TensorCore VMEM)


def criterion_emb_forward(outputs, logits, target, updates, params, tile_rows=256):
    N, H = outputs.shape
    V = logits.shape[1]
    mm_dtype = outputs.dtype            # native matmul dtype (bf16 in -> bf16 MXU)
    act_b = jnp.dtype(mm_dtype).itemsize
    lgt_b = jnp.dtype(logits.dtype).itemsize

    # --- per-generation tile sizing from real VMEM capacity ---
    vmem_cap = _vmem_capacity_bytes()
    budget = int(vmem_cap * 0.75)
    n_wbuf = 1 if _CONST_PIPELINE_MODE is not None else 2
    const_bytes = n_wbuf * (3 * H * V * act_b + 2 * V * 4)   # w1t, w2t, emb_table, b1, b2

    def tile_bytes(t):
        stream = 2 * t * (H * act_b + V * lgt_b + 4)          # double-buffered row inputs
        work = 9 * t * V * 4 + 3 * t * H * 4 + 64 * t         # live f32 intermediates (approx)
        return stream + work

    # (8,128)-safe row tile: multiple of 8 (16 for packed sub-32-bit inputs)
    align = 16 if min(act_b, lgt_b) < 4 else 8
    tile_n = min(_round_up(min(tile_rows, N), align), _round_up(N, align))
    while tile_n > align and const_bytes + tile_bytes(tile_n) > budget:
        tile_n -= align
    tile_n = max(tile_n, align)

    num_tiles = -(-N // tile_n)
    n_pad = num_tiles * tile_n
    if n_pad != N:
        # padded rows are masked out inside the kernel via the n_valid scalar
        outputs = jnp.pad(outputs, ((0, n_pad - N), (0, 0)))
        logits = jnp.pad(logits, ((0, n_pad - N), (0, 0)))
        target = jnp.pad(target, (0, n_pad - N))

    vmem_limit = int(min(max(const_bytes + tile_bytes(tile_n) + (4 << 20), 32 << 20),
                         int(vmem_cap * 0.9)))

    w1t = params["lin_w"].T.astype(mm_dtype)                  # (H, V)
    w2t = params["emb_lin_w"].T.astype(mm_dtype)              # (H, V)
    emb_tbl = params["emb_table"].astype(mm_dtype)            # (V, H), gathered in-kernel
    b1 = params["lin_b"].reshape(1, V).astype(jnp.float32)
    b2 = params["emb_lin_b"].reshape(1, V).astype(jnp.float32)
    tgt2d = target.reshape(n_pad, 1).astype(jnp.int32)
    flag = (jnp.asarray(updates, jnp.int32) >= PRETRAIN).astype(jnp.int32)
    scalars = jnp.stack([flag, jnp.asarray(N, jnp.int32)])    # SMEM scalar prefetch

    def const_spec(shape):
        if _CONST_PIPELINE_MODE is None:
            return pl.BlockSpec(shape, lambda i, s: (0, 0))
        return pl.BlockSpec(shape, lambda i, s: (0, 0),
                            pipeline_mode=_CONST_PIPELINE_MODE)

    grid_spec = pltpu.PrefetchScalarGridSpec(
        num_scalar_prefetch=1,
        grid=(num_tiles,),
        in_specs=[
            pl.BlockSpec((tile_n, H), lambda i, s: (i, 0)),    # outputs
            pl.BlockSpec((tile_n, V), lambda i, s: (i, 0)),    # logits
            const_spec((H, V)),                                # linear weight^T
            const_spec((1, V)),                                # linear bias
            const_spec((H, V)),                                # emb_linear weight^T
            const_spec((1, V)),                                # emb_linear bias
            const_spec((V, H)),                                # embedding table
            pl.BlockSpec((tile_n, 1), lambda i, s: (i, 0)),    # target
        ],
        out_specs=pl.BlockSpec((1, 1), lambda i, s: (i, 0),
                               memory_space=pltpu.SMEM),
    )

    partial = pl.pallas_call(
        _criterion_emb_kernel,
        out_shape=jax.ShapeDtypeStruct((num_tiles, 1), jnp.float32),
        grid_spec=grid_spec,
        compiler_params=pltpu.CompilerParams(
            dimension_semantics=("parallel",),
            vmem_limit_bytes=vmem_limit),
    )(scalars, outputs, logits, w1t, b1, w2t, b2, emb_tbl, tgt2d)
    return jnp.sum(partial)


def criterion_emb_ref(outputs, logits, target, updates, params):
    """Pure-JAX reference mirroring the PyTorch forward."""
    y2 = outputs @ params["lin_w"].T + params["lin_b"]
    emb = jax.nn.relu(params["emb_table"][target] @ params["emb_lin_w"].T
                      + params["emb_lin_b"])
    emb_prob = jax.nn.softmax(emb, axis=-1)
    row_w = (target != PAD).astype(jnp.float32)

    def ce(lg):
        lp = jax.nn.log_softmax(lg, axis=-1)
        nll = -jnp.take_along_axis(lp, target[:, None], axis=-1)[:, 0]
        return jnp.sum(row_w * nll)

    loss = ce(logits)
    eloss = ce(y2)
    out_prob = jax.nn.softmax(y2, axis=-1)
    out_low_prob = jax.nn.softmax(y2 * TAU_INVERSE, axis=-1)
    mask = (jnp.argmax(out_low_prob, axis=1) == target).astype(jnp.float32)
    eloss += -jnp.sum(jax.nn.log_softmax(emb, axis=-1) * (out_low_prob * mask[:, None]))
    p_at = jnp.take_along_axis(out_prob, target[:, None], axis=-1)
    eloss += MSE_STRENGTH * jnp.sum(jnp.abs(p_at - MAX_PROB))
    extra = -jnp.sum(jax.nn.log_softmax(logits, axis=-1) * emb_prob)
    return jnp.where(updates < PRETRAIN, loss + eloss, loss + eloss + extra)


if __name__ == "__main__":
    key = jax.random.PRNGKey(0)
    N, H, V = 16, 32, 32   # (batch*seq)=16, hidden=32, tgt_vocab=32
    ks = jax.random.split(key, 8)

    params = {
        "lin_w":     0.02 * jax.random.normal(ks[0], (V, H), jnp.float32),
        "lin_b":     0.02 * jax.random.normal(ks[1], (V,),   jnp.float32),
        "emb_table": 0.02 * jax.random.normal(ks[2], (V, H), jnp.float32),
        "emb_lin_w": 0.02 * jax.random.normal(ks[3], (V, H), jnp.float32),
        "emb_lin_b": 0.02 * jax.random.normal(ks[4], (V,),   jnp.float32),
    }
    outputs = jax.random.normal(ks[5], (N, H), jnp.float32)
    logits = jax.random.normal(ks[6], (N, V), jnp.float32)
    target = jax.random.randint(ks[7], (N,), 0, V, jnp.int32)

    # f32 path: both the pretrain and post-pretrain branch
    for updates in (0, 30000):
        got = criterion_emb_forward(outputs, logits, target, updates, params)
        jax.block_until_ready(got)
        ref = criterion_emb_ref(outputs, logits, target, updates, params)
        assert jnp.allclose(got, ref, rtol=1e-3, atol=1e-3), (updates, got, ref)

    # N not a multiple of 8: exercises the pad-and-mask row path
    got_p = criterion_emb_forward(outputs[:12], logits[:12], target[:12], 30000, params)
    jax.block_until_ready(got_p)
    ref_p = criterion_emb_ref(outputs[:12], logits[:12], target[:12], 30000, params)
    assert jnp.allclose(got_p, ref_p, rtol=1e-3, atol=1e-3), (got_p, ref_p)

    # bf16 activation/weight path: native-dtype MXU inputs, f32 accumulation
    bf16 = jnp.bfloat16
    got_b = criterion_emb_forward(outputs.astype(bf16), logits.astype(bf16),
                                  target, 30000, params)
    jax.block_until_ready(got_b)
    params_r = dict(
        params,
        lin_w=params["lin_w"].astype(bf16).astype(jnp.float32),
        emb_lin_w=params["emb_lin_w"].astype(bf16).astype(jnp.float32),
        emb_table=params["emb_table"].astype(bf16).astype(jnp.float32),
    )
    ref_b = criterion_emb_ref(outputs.astype(bf16).astype(jnp.float32),
                              logits.astype(bf16).astype(jnp.float32),
                              target, 30000, params_r)
    assert jnp.allclose(got_b, ref_b, rtol=5e-3, atol=5e-3), (got_b, ref_b)

    print("KERNEL_OK")
</pallas_src>

<mosaic_0001>
module attributes {stable_mosaic.version = 11 : i64} {
  func.func @_criterion_emb_kernel(%arg0: i32, %arg1: memref<2xi32, #tpu.memory_space<smem>>, %arg2: memref<16x32xf32, #tpu.memory_space<vmem>>, %arg3: memref<16x32xf32, #tpu.memory_space<vmem>>, %arg4: memref<32x32xf32, #tpu.memory_space<vmem>>, %arg5: memref<1x32xf32, #tpu.memory_space<vmem>>, %arg6: memref<32x32xf32, #tpu.memory_space<vmem>>, %arg7: memref<1x32xf32, #tpu.memory_space<vmem>>, %arg8: memref<32x32xf32, #tpu.memory_space<vmem>>, %arg9: memref<16x1xi32, #tpu.memory_space<vmem>>, %arg10: memref<1x1xf32, #tpu.memory_space<smem>>) attributes {dimension_semantics = [#tpu.dimension_semantics<parallel>], iteration_bounds = array<i64: 1>, scalar_prefetch = 1 : i64, scratch_operands = 0 : i64, tpu.core_type = #tpu.core_type<tc>, window_params = [{transform_indices = @transform_0, window_bounds = array<i64: 16, 32>}, {transform_indices = @transform_1, window_bounds = array<i64: 16, 32>}, {pipeline_mode = #tpu.pipeline_mode<synchronous>, transform_indices = @transform_2, window_bounds = array<i64: 32, 32>}, {pipeline_mode = #tpu.pipeline_mode<synchronous>, transform_indices = @transform_3, window_bounds = array<i64: 1, 32>}, {pipeline_mode = #tpu.pipeline_mode<synchronous>, transform_indices = @transform_4, window_bounds = array<i64: 32, 32>}, {pipeline_mode = #tpu.pipeline_mode<synchronous>, transform_indices = @transform_5, window_bounds = array<i64: 1, 32>}, {pipeline_mode = #tpu.pipeline_mode<synchronous>, transform_indices = @transform_6, window_bounds = array<i64: 32, 32>}, {transform_indices = @transform_7, window_bounds = array<i64: 16, 1>}, {transform_indices = @transform_8, window_bounds = array<i64: 1, 1>}]} {
    %c0 = arith.constant 0 : index
    %0 = memref.load %arg1[%c0] : memref<2xi32, #tpu.memory_space<smem>>
    %c1 = arith.constant 1 : index
    %1 = memref.load %arg1[%c1] : memref<2xi32, #tpu.memory_space<smem>>
    %c0_0 = arith.constant 0 : index
    %c0_1 = arith.constant 0 : index
    %2 = vector.load %arg2[%c0_0, %c0_1] : memref<16x32xf32, #tpu.memory_space<vmem>>, vector<16x32xf32>
    %c0_2 = arith.constant 0 : index
    %c0_3 = arith.constant 0 : index
    %3 = vector.load %arg3[%c0_2, %c0_3] : memref<16x32xf32, #tpu.memory_space<vmem>>, vector<16x32xf32>
    %c0_4 = arith.constant 0 : index
    %c0_5 = arith.constant 0 : index
    %4 = vector.load %arg9[%c0_4, %c0_5] : memref<16x1xi32, #tpu.memory_space<vmem>>, vector<16x1xi32>
    %5 = tpu.iota {dimensions = array<i32: 1>} : vector<16x32xi32>
    %6 = vector.broadcast %4 : vector<16x1xi32> to vector<16x32xi32>
    %7 = arith.cmpi eq, %5, %6 : vector<16x32xi32>
    %8 = arith.extui %7 : vector<16x32xi1> to vector<16x32xi32>
    %9 = arith.sitofp %8 : vector<16x32xi32> to vector<16x32xf32>
    %10 = tpu.iota {dimensions = array<i32: 0>} : vector<16x1xi32>
    %c16_i32 = arith.constant 16 : i32
    %11 = arith.muli %arg0, %c16_i32 : i32
    %12 = vector.broadcast %11 : i32 to vector<16x1xi32>
    %13 = arith.addi %10, %12 : vector<16x1xi32>
    %14 = vector.broadcast %1 : i32 to vector<16x1xi32>
    %15 = arith.cmpi slt, %13, %14 : vector<16x1xi32>
    %16 = arith.extui %15 : vector<16x1xi1> to vector<16x1xi32>
    %17 = arith.sitofp %16 : vector<16x1xi32> to vector<16x1xf32>
    %c0_i32 = arith.constant 0 : i32
    %18 = vector.broadcast %c0_i32 : i32 to vector<16x1xi32>
    %19 = arith.cmpi ne, %4, %18 : vector<16x1xi32>
    %20 = arith.andi %15, %19 : vector<16x1xi1>
    %21 = arith.extui %20 : vector<16x1xi1> to vector<16x1xi32>
    %22 = arith.sitofp %21 : vector<16x1xi32> to vector<16x1xf32>
    %c0_6 = arith.constant 0 : index
    %c0_7 = arith.constant 0 : index
    %23 = vector.load %arg4[%c0_6, %c0_7] : memref<32x32xf32, #tpu.memory_space<vmem>>, vector<32x32xf32>
    %cst = arith.constant dense<0.000000e+00> : vector<16x32xf32>
    %24 = tpu.matmul %2, %23, %cst {dimension_numbers = #tpu.dot_dimension_numbers<[1], [0], [0], [1], [0, 0, 1, 1], [], []>} : vector<16x32xf32>, vector<32x32xf32>, vector<16x32xf32> -> vector<16x32xf32>
    %c0_8 = arith.constant 0 : index
    %c0_9 = arith.constant 0 : index
    %25 = vector.load %arg5[%c0_8, %c0_9] : memref<1x32xf32, #tpu.memory_space<vmem>>, vector<1x32xf32>
    %26 = vector.broadcast %25 : vector<1x32xf32> to vector<16x32xf32>
    %27 = arith.addf %24, %26 : vector<16x32xf32>
    %c0_10 = arith.constant 0 : index
    %c0_11 = arith.constant 0 : index
    %28 = vector.load %arg8[%c0_10, %c0_11] : memref<32x32xf32, #tpu.memory_space<vmem>>, vector<32x32xf32>
    %cst_12 = arith.constant dense<0.000000e+00> : vector<16x32xf32>
    %29 = tpu.matmul %9, %28, %cst_12 {dimension_numbers = #tpu.dot_dimension_numbers<[1], [0], [0], [1], [0, 0, 1, 1], [], []>} : vector<16x32xf32>, vector<32x32xf32>, vector<16x32xf32> -> vector<16x32xf32>
    %c0_13 = arith.constant 0 : index
    %c0_14 = arith.constant 0 : index
    %30 = vector.load %arg6[%c0_13, %c0_14] : memref<32x32xf32, #tpu.memory_space<vmem>>, vector<32x32xf32>
    %cst_15 = arith.constant dense<0.000000e+00> : vector<16x32xf32>
    %31 = tpu.matmul %29, %30, %cst_15 {dimension_numbers = #tpu.dot_dimension_numbers<[1], [0], [0], [1], [0, 0, 1, 1], [], []>} : vector<16x32xf32>, vector<32x32xf32>, vector<16x32xf32> -> vector<16x32xf32>
    %c0_16 = arith.constant 0 : index
    %c0_17 = arith.constant 0 : index
    %32 = vector.load %arg7[%c0_16, %c0_17] : memref<1x32xf32, #tpu.memory_space<vmem>>, vector<1x32xf32>
    %33 = vector.broadcast %32 : vector<1x32xf32> to vector<16x32xf32>
    %34 = arith.addf %31, %33 : vector<16x32xf32>
    %cst_18 = arith.constant 0.000000e+00 : f32
    %35 = vector.broadcast %cst_18 : f32 to vector<16x32xf32>
    %36 = arith.maximumf %34, %35 : vector<16x32xf32>
    %cst_19 = arith.constant dense<0xFF800000> : vector<16xf32>
    %37 = vector.multi_reduction <maximumf>, %27, %cst_19 [1] : vector<16x32xf32> to vector<16xf32>
    %38 = vector.shape_cast %37 : vector<16xf32> to vector<16x1xf32>
    %cst_20 = arith.constant dense<0xFF800000> : vector<16xf32>
    %39 = vector.multi_reduction <maximumf>, %36, %cst_20 [1] : vector<16x32xf32> to vector<16xf32>
    %40 = vector.shape_cast %39 : vector<16xf32> to vector<16x1xf32>
    %cst_21 = arith.constant dense<0xFF800000> : vector<16xf32>
    %41 = vector.multi_reduction <maximumf>, %3, %cst_21 [1] : vector<16x32xf32> to vector<16xf32>
    %42 = vector.shape_cast %41 : vector<16xf32> to vector<16x1xf32>
    %43 = vector.broadcast %38 : vector<16x1xf32> to vector<16x32xf32>
    %44 = arith.subf %27, %43 : vector<16x32xf32>
    %cst_22 = arith.constant 5.000000e-01 : f32
    %45 = vector.broadcast %cst_22 : f32 to vector<16x32xf32>
    %46 = arith.mulf %44, %45 : vector<16x32xf32>
    %47 = math.exp %46 : vector<16x32xf32>
    %48 = arith.mulf %47, %47 : vector<16x32xf32>
    %49 = vector.broadcast %40 : vector<16x1xf32> to vector<16x32xf32>
    %50 = arith.subf %36, %49 : vector<16x32xf32>
    %51 = math.exp %50 : vector<16x32xf32>
    %52 = vector.broadcast %42 : vector<16x1xf32> to vector<16x32xf32>
    %53 = arith.subf %3, %52 : vector<16x32xf32>
    %54 = math.exp %53 : vector<16x32xf32>
    %cst_23 = arith.constant dense<0.000000e+00> : vector<16xf32>
    %55 = vector.multi_reduction <add>, %48, %cst_23 [1] : vector<16x32xf32> to vector<16xf32>
    %56 = vector.shape_cast %55 : vector<16xf32> to vector<16x1xf32>
    %cst_24 = arith.constant dense<0.000000e+00> : vector<16xf32>
    %57 = vector.multi_reduction <add>, %47, %cst_24 [1] : vector<16x32xf32> to vector<16xf32>
    %58 = vector.shape_cast %57 : vector<16xf32> to vector<16x1xf32>
    %cst_25 = arith.constant dense<0.000000e+00> : vector<16xf32>
    %59 = vector.multi_reduction <add>, %51, %cst_25 [1] : vector<16x32xf32> to vector<16xf32>
    %60 = vector.shape_cast %59 : vector<16xf32> to vector<16x1xf32>
    %cst_26 = arith.constant dense<0.000000e+00> : vector<16xf32>
    %61 = vector.multi_reduction <add>, %54, %cst_26 [1] : vector<16x32xf32> to vector<16xf32>
    %62 = vector.shape_cast %61 : vector<16xf32> to vector<16x1xf32>
    %63 = math.log %56 : vector<16x1xf32>
    %64 = math.log %60 : vector<16x1xf32>
    %65 = math.log %62 : vector<16x1xf32>
    %cst_27 = arith.constant 0.000000e+00 : f32
    %66 = vector.broadcast %cst_27 : f32 to vector<16x32xf32>
    %67 = arith.select %7, %27, %66 : vector<16x32xi1>, vector<16x32xf32>
    %cst_28 = arith.constant dense<0.000000e+00> : vector<16xf32>
    %68 = vector.multi_reduction <add>, %67, %cst_28 [1] : vector<16x32xf32> to vector<16xf32>
    %69 = vector.shape_cast %68 : vector<16xf32> to vector<16x1xf32>
    %cst_29 = arith.constant 0.000000e+00 : f32
    %70 = vector.broadcast %cst_29 : f32 to vector<16x32xf32>
    %71 = arith.select %7, %3, %70 : vector<16x32xi1>, vector<16x32xf32>
    %cst_30 = arith.constant dense<0.000000e+00> : vector<16xf32>
    %72 = vector.multi_reduction <add>, %71, %cst_30 [1] : vector<16x32xf32> to vector<16xf32>
    %73 = vector.shape_cast %72 : vector<16xf32> to vector<16x1xf32>
    %74 = arith.subf %69, %38 : vector<16x1xf32>
    %75 = arith.subf %74, %63 : vector<16x1xf32>
    %76 = arith.subf %73, %42 : vector<16x1xf32>
    %77 = arith.subf %76, %65 : vector<16x1xf32>
    %cst_31 = arith.constant 0.000000e+00 : f32
    %78 = vector.broadcast %cst_31 : f32 to vector<16x1xf32>
    %79 = arith.subf %78, %77 : vector<16x1xf32>
    %80 = arith.mulf %22, %79 : vector<16x1xf32>
    %81 = vector.shape_cast %80 : vector<16x1xf32> to vector<1x16x1xf32>
    %cst_32 = arith.constant dense<0.000000e+00> : vector<1xf32>
    %82 = vector.multi_reduction <add>, %81, %cst_32 [1, 2] : vector<1x16x1xf32> to vector<1xf32>
    %83 = vector.shape_cast %82 : vector<1xf32> to vector<1x1x1xf32>
    %84 = vector.extract %83[0, 0, 0] : f32 from vector<1x1x1xf32>
    %cst_33 = arith.constant 0.000000e+00 : f32
    %85 = vector.broadcast %cst_33 : f32 to vector<16x1xf32>
    %86 = arith.subf %85, %75 : vector<16x1xf32>
    %87 = arith.mulf %22, %86 : vector<16x1xf32>
    %88 = vector.shape_cast %87 : vector<16x1xf32> to vector<1x16x1xf32>
    %cst_34 = arith.constant dense<0.000000e+00> : vector<1xf32>
    %89 = vector.multi_reduction <add>, %88, %cst_34 [1, 2] : vector<1x16x1xf32> to vector<1xf32>
    %90 = vector.shape_cast %89 : vector<1xf32> to vector<1x1x1xf32>
    %91 = vector.extract %90[0, 0, 0] : f32 from vector<1x1x1xf32>
    %92 = arith.cmpf oge, %69, %38 : vector<16x1xf32>
    %93 = arith.andi %15, %92 : vector<16x1xi1>
    %94 = arith.extui %93 : vector<16x1xi1> to vector<16x1xi32>
    %95 = arith.sitofp %94 : vector<16x1xi32> to vector<16x1xf32>
    %96 = arith.mulf %36, %47 : vector<16x32xf32>
    %cst_35 = arith.constant dense<0.000000e+00> : vector<16xf32>
    %97 = vector.multi_reduction <add>, %96, %cst_35 [1] : vector<16x32xf32> to vector<16xf32>
    %98 = vector.shape_cast %97 : vector<16xf32> to vector<16x1xf32>
    %99 = arith.divf %98, %58 : vector<16x1xf32>
    %100 = arith.subf %99, %40 : vector<16x1xf32>
    %101 = arith.subf %100, %64 : vector<16x1xf32>
    %102 = arith.mulf %95, %101 : vector<16x1xf32>
    %103 = vector.shape_cast %102 : vector<16x1xf32> to vector<1x16x1xf32>
    %cst_36 = arith.constant dense<0.000000e+00> : vector<1xf32>
    %104 = vector.multi_reduction <add>, %103, %cst_36 [1, 2] : vector<1x16x1xf32> to vector<1xf32>
    %105 = vector.shape_cast %104 : vector<1xf32> to vector<1x1x1xf32>
    %106 = vector.extract %105[0, 0, 0] : f32 from vector<1x1x1xf32>
    %cst_37 = arith.constant 0.000000e+00 : f32
    %107 = arith.subf %cst_37, %106 : f32
    %108 = math.exp %75 : vector<16x1xf32>
    %cst_38 = arith.constant 0.899999976 : f32
    %109 = vector.broadcast %cst_38 : f32 to vector<16x1xf32>
    %110 = arith.subf %108, %109 : vector<16x1xf32>
    %111 = math.absf %110 : vector<16x1xf32>
    %112 = arith.mulf %17, %111 : vector<16x1xf32>
    %113 = vector.shape_cast %112 : vector<16x1xf32> to vector<1x16x1xf32>
    %cst_39 = arith.constant dense<0.000000e+00> : vector<1xf32>
    %114 = vector.multi_reduction <add>, %113, %cst_39 [1, 2] : vector<1x16x1xf32> to vector<1xf32>
    %115 = vector.shape_cast %114 : vector<1xf32> to vector<1x1x1xf32>
    %116 = vector.extract %115[0, 0, 0] : f32 from vector<1x1x1xf32>
    %117 = arith.addf %84, %91 : f32
    %118 = arith.addf %117, %107 : f32
    %cst_40 = arith.constant 1.000000e+00 : f32
    %119 = arith.mulf %cst_40, %116 : f32
    %120 = arith.addf %118, %119 : f32
    %c0_41 = arith.constant 0 : index
    %c0_42 = arith.constant 0 : index
    %121 = memref.load %arg10[%c0_41, %c0_42] : memref<1x1xf32, #tpu.memory_space<smem>>
    memref.store %120, %arg10[%c0_41, %c0_42] : memref<1x1xf32, #tpu.memory_space<smem>>
    %c0_i32_43 = arith.constant 0 : i32
    %122 = arith.cmpi ne, %0, %c0_i32_43 : i32
    %123 = arith.extui %122 : i1 to i32
    %c0_i32_44 = arith.constant 0 : i32
    %124 = arith.cmpi ne, %123, %c0_i32_44 : i32
    scf.if %124 {
      %125 = arith.mulf %3, %51 : vector<16x32xf32>
      %cst_45 = arith.constant dense<0.000000e+00> : vector<16xf32>
      %126 = vector.multi_reduction <add>, %125, %cst_45 [1] : vector<16x32xf32> to vector<16xf32>
      %127 = vector.shape_cast %126 : vector<16xf32> to vector<16x1xf32>
      %128 = arith.divf %127, %60 : vector<16x1xf32>
      %129 = arith.subf %128, %42 : vector<16x1xf32>
      %130 = arith.subf %129, %65 : vector<16x1xf32>
      %c0_46 = arith.constant 0 : index
      %c0_47 = arith.constant 0 : index
      %131 = memref.load %arg10[%c0_46, %c0_47] : memref<1x1xf32, #tpu.memory_space<smem>>
      %132 = arith.mulf %17, %130 : vector<16x1xf32>
      %133 = vector.shape_cast %132 : vector<16x1xf32> to vector<1x16x1xf32>
      %cst_48 = arith.constant dense<0.000000e+00> : vector<1xf32>
      %134 = vector.multi_reduction <add>, %133, %cst_48 [1, 2] : vector<1x16x1xf32> to vector<1xf32>
      %135 = vector.shape_cast %134 : vector<1xf32> to vector<1x1x1xf32>
      %136 = vector.extract %135[0, 0, 0] : f32 from vector<1x1x1xf32>
      %137 = arith.subf %131, %136 : f32
      %c0_49 = arith.constant 0 : index
      %c0_50 = arith.constant 0 : index
      %138 = memref.load %arg10[%c0_49, %c0_50] : memref<1x1xf32, #tpu.memory_space<smem>>
      memref.store %137, %arg10[%c0_49, %c0_50] : memref<1x1xf32, #tpu.memory_space<smem>>
    } else {
    }
    return
  }
  func.func @transform_0(%arg0: i32, %arg1: memref<2xi32, #tpu.memory_space<smem>>) -> (i32, i32) {
    %c0_i32 = arith.constant 0 : i32
    %c0_i32_0 = arith.constant 0 : i32
    return %arg0, %c0_i32 : i32, i32
  }
  func.func @transform_1(%arg0: i32, %arg1: memref<2xi32, #tpu.memory_space<smem>>) -> (i32, i32) {
    %c0_i32 = arith.constant 0 : i32
    %c0_i32_0 = arith.constant 0 : i32
    return %arg0, %c0_i32 : i32, i32
  }
  func.func @transform_2(%arg0: i32, %arg1: memref<2xi32, #tpu.memory_space<smem>>) -> (i32, i32) {
    %c0_i32 = arith.constant 0 : i32
    %c0_i32_0 = arith.constant 0 : i32
    %c0_i32_1 = arith.constant 0 : i32
    return %c0_i32, %c0_i32_0 : i32, i32
  }
  func.func @transform_3(%arg0: i32, %arg1: memref<2xi32, #tpu.memory_space<smem>>) -> (i32, i32) {
    %c0_i32 = arith.constant 0 : i32
    %c0_i32_0 = arith.constant 0 : i32
    %c0_i32_1 = arith.constant 0 : i32
    return %c0_i32, %c0_i32_0 : i32, i32
  }
  func.func @transform_4(%arg0: i32, %arg1: memref<2xi32, #tpu.memory_space<smem>>) -> (i32, i32) {
    %c0_i32 = arith.constant 0 : i32
    %c0_i32_0 = arith.constant 0 : i32
    %c0_i32_1 = arith.constant 0 : i32
    return %c0_i32, %c0_i32_0 : i32, i32
  }
  func.func @transform_5(%arg0: i32, %arg1: memref<2xi32, #tpu.memory_space<smem>>) -> (i32, i32) {
    %c0_i32 = arith.constant 0 : i32
    %c0_i32_0 = arith.constant 0 : i32
    %c0_i32_1 = arith.constant 0 : i32
    return %c0_i32, %c0_i32_0 : i32, i32
  }
  func.func @transform_6(%arg0: i32, %arg1: memref<2xi32, #tpu.memory_space<smem>>) -> (i32, i32) {
    %c0_i32 = arith.constant 0 : i32
    %c0_i32_0 = arith.constant 0 : i32
    %c0_i32_1 = arith.constant 0 : i32
    return %c0_i32, %c0_i32_0 : i32, i32
  }
  func.func @transform_7(%arg0: i32, %arg1: memref<2xi32, #tpu.memory_space<smem>>) -> (i32, i32) {
    %c0_i32 = arith.constant 0 : i32
    %c0_i32_0 = arith.constant 0 : i32
    return %arg0, %c0_i32 : i32, i32
  }
  func.func @transform_8(%arg0: i32, %arg1: memref<2xi32, #tpu.memory_space<smem>>) -> (i32, i32) {
    %c0_i32 = arith.constant 0 : i32
    %c0_i32_0 = arith.constant 0 : i32
    return %arg0, %c0_i32 : i32, i32
  }
}

</mosaic_0001>

<bundles_post_ra>
// kernel: tpu_custom_call.1
= control target key start
LH: loop header
LB: loop body
LE: loop exit
PB: predicated region body
PF: predicated region fallthrough
CT: control target
= control target key end

     0   :  { %s773_s12 = smov [#allocation3]   ;;  %s1083_s0 = inlined_call_operand.vmem [shape: s32[2], index: 0, kind: input, shape index: {}]   ;;  %s1084_s1 = inlined_call_operand.vmem [shape: f32[16,32], index: 1, kind: input, shape index: {}]   ;;  %s1085_s2 = inlined_call_operand.hbm [shape: f32[16,32], index: 2, kind: input, shape index: {}]   ;;  %s1086_s3 = inlined_call_operand.hbm [shape: f32[32,32], index: 3, kind: input, shape index: {}]   ;;  %s1087_s4 = inlined_call_operand.vmem [shape: f32[1,32], index: 4, kind: input, shape index: {}]   ;;  %s1088_s5 = inlined_call_operand.hbm [shape: f32[32,32], index: 5, kind: input, shape index: {}]   ;;  %s1089_s6 = inlined_call_operand.vmem [shape: f32[1,32], index: 6, kind: input, shape index: {}]   ;;  %s1090_s7 = inlined_call_operand.hbm [shape: f32[32,32], index: 7, kind: input, shape index: {}]   ;;  %s1091_s8 = inlined_call_operand.vmem [shape: s32[16,1], index: 8, kind: input, shape index: {}]   ;;  %s1092_s9 = inlined_call_operand.hbm [shape: f32[1,1], index: 9, kind: output, shape index: {}]  }
   0x1   :  { %s15_s11 = sshll.u32 %s1083_s0, 4  ;;  %s16_s11 = int_to_ptr.vmem [resolvable:$true] %s15_s11 }
   0x2   :  { %18 = dma.vmem_to_smem %s16_s11, 16, %s773_s12, [#allocation2] }
   0x3   :  { %763 = dma.done.wait [#allocation2], 16 }
   0x4   :  { %764 = vsyncadd [#allocation2], 4294967280 }
   0x5   :  { %21 = sfence }
   0x6   :  { %22 = vsyncpa [#allocation5], 0 }
   0x7   :  { %23 = vsyncpa [#allocation8], 0 }
   0x8   :  { %24 = vsyncpa [#allocation11], 0 }
   0x9   :  { %25 = vsyncpa [#allocation6], 0  ;;  %s45_s15 = sshll.u32 %s1086_s3, 4  ;;  %s774_s16 = smov [#allocation7]   ;;  %s46_s15 = int_to_ptr.hbm [resolvable:$true] %s45_s15 }
   0xa   :  { %s47_s17 = sshll.u32 %s774_s16, 4  ;;  %s32_s19 = sshll.u32 %s1085_s2, 4  ;;  %s48_s17 = int_to_ptr.vmem [resolvable:$true] %s47_s17  ;;  %s33_s19 = int_to_ptr.hbm [resolvable:$true] %s32_s19 }
   0xb   :  { %s775_s20 = smov 128   ;;  %s776_s21 = smov 8  }
   0xc   :  { %53 = dma.hbm_to_vmem [thread:$0]  %s46_s15, 512, %s48_s17, [#allocation8], %s775_s20, %s775_s20, %s776_s21  }
   0xd   :  { %s777_s22 = smov [#allocation4]   ;;  %s60_s26 = sshll.u32 %s1088_s5, 4  ;;  %s61_s26 = int_to_ptr.hbm [resolvable:$true] %s60_s26 }
   0xe   :  { %s34_s23 = sshll.u32 %s777_s22, 4  ;;  %s75_s28 = sshll.u32 %s1090_s7, 4  ;;  %s35_s23 = int_to_ptr.vmem [resolvable:$true] %s34_s23  ;;  %s76_s28 = int_to_ptr.hbm [resolvable:$true] %s75_s28 }
   0xf   :  { %40 = dma.hbm_to_vmem [thread:$0]  %s33_s19, 256, %s35_s23, [#allocation5], %s775_s20, %s775_s20, %s776_s21  }
  0x10   :  { %s778_s29 = smov [#allocation9]   ;;  %s779_s2 = smov [#allocation10]  }
  0x11   :  { %s62_s30 = sshll.u32 %s778_s29, 4  ;;  %s77_s10 = sshll.u32 %s779_s2, 4  ;;  %s63_s30 = int_to_ptr.vmem [resolvable:$true] %s62_s30  ;;  %s78_s10 = int_to_ptr.vmem [resolvable:$true] %s77_s10 }
  0x12   :  { %68 = dma.hbm_to_vmem [thread:$0]  %s61_s26, 512, %s63_s30, [#allocation8], %s775_s20, %s775_s20, %s776_s21  }
  0x13   :  { %83 = dma.hbm_to_vmem [thread:$0]  %s76_s28, 512, %s78_s10, [#allocation11], %s775_s20, %s775_s20, %s776_s21  }
  0x14   :  { %765 = dma.done.wait [#allocation5], 256  }
  0x15   :  { %766 = vsyncadd [#allocation5], 4294967040 }
  0x16   :  { %767 = dma.done.wait [#allocation8], 1024  }
  0x17   :  { %768 = vsyncadd [#allocation8], 4294966272 }
  0x18   :  { %769 = dma.done.wait [#allocation11], 512  }
  0x19   :  { %770 = vsyncadd [#allocation11], 4294966784  ;;  %s848_s5 = sld [smem:[#allocation3]]  ;;  %v780_v0 = vmov 0   ;;  %v149_v1 = vld [vmem:[#allocation7 + $0x18] sm:$0xff]  ;;  %v853_v2 = vld [vmem:[%s1091_s8] sm:$0xff]  ;;  %v110_v16 = vlaneseq }
  0x1a   :  { %604 = vset.pattern.permute.xlu0 %v780_v0  ;;  %v148_v3 = vld [vmem:[#allocation7 + $0x10] sm:$0xff]  ;;  %173 = vmatpush.msra.mxu0 %v149_v1  ;;  %v147_v4 = vld [vmem:[#allocation7 + $0x8] sm:$0xff]  ;;  %v187_v5 = vld [vmem:[#allocation10 + $0x18] sm:$0xff]  ;;  %vm154_vm0 = vcmask 261120   ;;  %v781_v21 = vmov 0.0   ;;  %vm138_vm3 = vcmp.ne.s32.totalorder %v853_v2, 0 }
  0x1b   :  { %580 = vmatpush.msra.mxu3 %v149_v1  ;;  %113 = vperm.xlu0 %604, %v853_v2   ;;  %v186_v6 = vld [vmem:[#allocation10 + $0x10] sm:$0xff]  ;;  %v146_v7 = vld [vmem:[#allocation7] sm:$0xff]  ;;  %v105_v9 = vld [vmem:[%s1084_s1 + $0x8] sm:$0xff]  ;;  %v875_v17 = vand.u32 127, %v110_v16  ;;  %vm360_vm9 = vcmask 7168  }
  0x1c   :  { %174 = vmatpush.msra.mxu0 %v148_v3  ;;  %206 = vmatpush.msra.mxu1 %v187_v5  ;;  %v104_v8 = vld [vmem:[%s1084_s1] sm:$0xff]  ;;  %v185_v10 = vld [vmem:[#allocation10 + $0x8] sm:$0xff]  ;;  %v865_v11 = vld [vmem:[%s1091_s8 + $0x8] sm:$0xff] }
  0x1d   :  { %581 = vmatpush.msra.mxu3 %v148_v3  ;;  %v184_v12 = vld [vmem:[#allocation10] sm:$0xff]  ;;  %v870_v13 = vld [vmem:[#allocation4] sm:$0xff]  ;;  %v220_v15 = vld [vmem:[#allocation9 + $0x18] sm:$0xff]  ;;  %vm139_vm4 = vcmp.ne.s32.totalorder %v865_v11, 0 }
  0x1e   :  { %175 = vmatpush.msra.mxu0 %v147_v4  ;;  %207 = vmatpush.msra.mxu1 %v186_v6  ;;  %v268_v14 = vsel %vm154_vm0, %v870_v13, -inf  ;;  %v219_v18 = vld [vmem:[#allocation9 + $0x10] sm:$0xff]  ;;  %v218_v19 = vld [vmem:[#allocation9 + $0x8] sm:$0xff]  ;;  %v217_v32 = vld [vmem:[#allocation9] sm:$0xff] }
  0x1f   :  { %582 = vmatpush.msra.mxu3 %v147_v4  ;;  %269 = vmax.xlane.f32.xlu2 %v268_v14  ;;  %v605_v25 = vld [vmem:[%s1087_s4] ss:$0 sm:$0xff]  ;;  %v899_v33 = vld [vmem:[#allocation4 + $0x8] sm:$0xff]  ;;  %p579_p0 = scmp.eq.s32.totalorder %s848_s5, 0 }
  0x20   :  { %176 = vmatpush.msra.mxu0 %v146_v7  ;;  %208 = vmatpush.msra.mxu1 %v185_v10  ;;  %v271_v34 = vsel %vm154_vm0, %v899_v33, -inf  ;;  %v606_v55 = vld [vmem:[%s1089_s6] ss:$0 sm:$0xff]  ;;  %s562_s6 = sld [smem:[#allocation3 + $0x1]] }
  0x21   :  { %583 = vmatpush.msra.mxu3 %v146_v7  ;;  %569 = vmatmul.msk.f32.vlgmr.msra.gmra.mxu0 %vm154_vm0, %v104_v8 }
  0x22   :  { %570 = vmatmul.msk.f32.vlgmr.msra.gmra.mxu3 %vm154_vm0, %v105_v9  ;;  %209 = vmatpush.msra.mxu1 %v184_v12 }
  0x23   :  { %116 = vperm.xlu0 %604, %v865_v11   ;;  %243 = vmatpush.msra.mxu2 %v220_v15 }
  0x25   :  { %244 = vmatpush.msra.mxu2 %v219_v18 }
  0x27   :  { %245 = vmatpush.msra.mxu2 %v218_v19  ;;  %272 = vmax.xlane.f32.xlu2 %v271_v34 }
  0x29   :  { %246 = vmatpush.msra.mxu2 %v217_v32 }
  0x8d   :  { %v114_v20 = vpop.permute.xlu0 %113 }
  0x8e   :  { %vm118_vm1 = vcmp.eq.s32.totalorder %v875_v17, %v114_v20 }
  0x8f   :  { %v563_v22 = vsel %vm118_vm1, 1.0, %v781_v21  ;;  %v340_v52 = vsel %vm118_vm1, %v870_v13, 0.0 }
  0x90   :  { %571 = vmatmul.msk.f32.vlgmr.msra.gmra.mxu1 %vm154_vm0, %v563_v22  ;;  %v342_v53 = vsel %vm154_vm0, %v340_v52, 0.0 }
  0x92   :  { %v908_v41 = vpop.xlane.xlu2 %269 }
  0x93   :  { %v290_v42 = vsub.f32 %v870_v13, %v908_v41 }
  0x95   :  { %v882_v23 = vpop.permute.xlu0 %116  ;;  %v292_v45 = vmul.f32 1.442695, %v290_v42 }
  0x96   :  { %vm119_vm2 = vcmp.eq.s32.totalorder %v875_v17, %v882_v23 }
  0x97   :  { %v564_v24 = vsel %vm119_vm2, 1.0, %v781_v21  ;;  %v341_v1 = vsel %vm119_vm2, %v899_v33, 0.0 }
  0x98   :  { %572 = vmatmul.msk.f32.gmra.mxu1 %vm154_vm0, %v564_v24  ;;  %v345_v4 = vsel %vm154_vm0, %v341_v1, 0.0 }
  0x9a   :  { %v941_v6 = vpop.xlane.xlu2 %272 }
  0x9b   :  { %v291_v8 = vsub.f32 %v899_v33, %v941_v6 }
  0x9d   :  { %v294_v10 = vmul.f32 1.442695, %v291_v8 }
  0x9e   :  { %v178_v26 = vpop.f32.mrf.mxu0 }
  0x9f   :  { %v179_v27 = vadd.f32 %v605_v25, %v178_v26 }
  0xa1   :  { %v256_v28 = vsel %vm154_vm0, %v179_v27, -inf  ;;  %v332_v50 = vsel %vm118_vm1, %v179_v27, 0.0 }
  0xa2   :  { %257 = vmax.xlane.f32.xlu1 %v256_v28  ;;  %v334_v51 = vsel %vm154_vm0, %v332_v50, 0.0 }
  0xa5   :  { %v181_v29 = vpop.f32.mrf.mxu3 }
  0xa6   :  { %v895_v30 = vadd.f32 %v605_v25, %v181_v29 }
  0xa8   :  { %v259_v31 = vsel %vm154_vm0, %v895_v30, -inf  ;;  %v333_v19 = vsel %vm119_vm2, %v895_v30, 0.0 }
  0xa9   :  { %v337_v20 = vsel %vm154_vm0, %v333_v19, 0.0 }
  0xaa   :  { %260 = vmax.xlane.f32.xlu1 %v259_v31 }
 0x10d   :  { %v211_v35 = vpop.f32.mrf.mxu1 }
 0x10e   :  { %573 = vmatmul.msk.f32.vlgmr.msra.gmra.mxu2 %vm154_vm0, %v211_v35 }
 0x115   :  { %v214_v36 = vpop.f32.mrf.mxu1  ;;  %v904_v37 = vpop.xlane.xlu1 %257 }
 0x116   :  { %574 = vmatmul.msk.f32.gmra.mxu2 %vm154_vm0, %v214_v36  ;;  %v274_v38 = vsub.f32 %v179_v27, %v904_v37 }
 0x118   :  { %v276_v39 = vmul.f32 0.5, %v274_v38 }
 0x11a   :  { %v278_v40 = vmul.f32 1.442695, %v276_v39 }
 0x11c   :  { %607 = vpow2.f32 %v278_v40 }
 0x11d   :  { %609 = vpow2.f32 %v292_v45  ;;  %v927_v54 = vpop.xlane.xlu1 %260 }
 0x11e   :  { %v275_v56 = vsub.f32 %v895_v30, %v927_v54 }
 0x120   :  { %v277_v60 = vmul.f32 0.5, %v275_v56 }
 0x122   :  { %v912_v43 = vpop.eup %607  ;;  %v280_v62 = vmul.f32 1.442695, %v277_v60 }
 0x123   :  { %v302_v44 = vsel %vm154_vm0, %v912_v43, 0.0  ;;  %v282_v46 = vmul.f32 %v912_v43, %v912_v43  ;;  %v610_v48 = vpop.eup %609 }
 0x124   :  { %303 = vadd.xlane.f32.xlu2 %v302_v44  ;;  %v314_v49 = vsel %vm154_vm0, %v610_v48, 0.0  ;;  %611 = vpow2.f32 %v280_v62 }
 0x125   :  { %v296_v47 = vsel %vm154_vm0, %v282_v46, 0.0  ;;  %613 = vpow2.f32 %v294_v10 }
 0x12a   :  { %v612_v7 = vpop.eup %611 }
 0x12b   :  { %v305_v9 = vsel %vm154_vm0, %v612_v7, 0.0  ;;  %v283_v12 = vmul.f32 %v612_v7, %v612_v7  ;;  %v614_v15 = vpop.eup %613 }
 0x12c   :  { %297 = vadd.xlane.f32.xlu2 %v296_v47  ;;  %v317_v18 = vsel %vm154_vm0, %v614_v15, 0.0 }
 0x12d   :  { %v299_v14 = vsel %vm154_vm0, %v283_v12, 0.0 }
 0x134   :  { %315 = vadd.xlane.f32.xlu2 %v314_v49 }
 0x13c   :  { %335 = vadd.xlane.f32.xlu2 %v334_v51 }
 0x144   :  { %343 = vadd.xlane.f32.xlu2 %v342_v53 }
 0x191   :  { %v248_v57 = vpop.f32.mrf.mxu2 }
 0x192   :  { %v249_v58 = vadd.f32 %v606_v55, %v248_v57 }
 0x194   :  { %v254_v59 = vmax.f32 %v249_v58, 0.0 }
 0x196   :  { %v262_v61 = vsel %vm154_vm0, %v254_v59, -inf  ;;  %v397_v44 = vmul.f32 %v912_v43, %v254_v59  ;;  %v131_v43 = vstv %s562_s6 }
 0x197   :  { %263 = vmax.xlane.f32.xlu0 %v262_v61  ;;  %v953_v22 = vpop.xlane.xlu2 %303 }
 0x198   :  { %v399_v47 = vsel %vm154_vm0, %v397_v44, 0.0  ;;  %vm410_vm13 = vweird.f32 %v953_v22 }
 0x199   :  { %v251_v63 = vpop.f32.mrf.mxu2 }
 0x19a   :  { %v252_v0 = vadd.f32 %v606_v55, %v251_v63  ;;  %v125_v55 = vshrl.u32 %v110_v16, 7 }
 0x19c   :  { %v255_v3 = vmax.f32 %v252_v0, 0.0  ;;  %v126_v56 = vadd.s32 8, %v125_v55  ;;  %vm985_vm5 = vcmp.lt.s32.totalorder %v125_v55, %v131_v43 }
 0x19d   :  { %vm140_vm6 = vmand %vm985_vm5, %vm138_vm3 }
 0x19e   :  { %v265_v5 = vsel %vm154_vm0, %v255_v3, -inf  ;;  %v398_v34 = vmul.f32 %v612_v7, %v255_v3  ;;  %vm991_vm7 = vcmp.lt.s32.totalorder %v126_v56, %v131_v43 }
 0x19f   :  { %346 = vadd.xlane.f32.xlu0 %v345_v4  ;;  %266 = vmax.xlane.f32.xlu1 %v265_v5  ;;  %v298_v24 = vpop.xlane.xlu2 %297  ;;  %vm141_vm8 = vmand %vm991_vm7, %vm139_vm4  ;;  %v567_v5 = vsel %vm140_vm6, 1.0, %v781_v21  ;;  %v1019_v44 = vsel %vm991_vm7, 1.0, %v781_v21 }
 0x1a0   :  { %v402_v38 = vsel %vm154_vm0, %v398_v34, 0.0  ;;  %v568_v8 = vsel %vm141_vm8, 1.0, %v781_v21 }
 0x1a7   :  { %306 = vadd.xlane.f32.xlu1 %v305_v9  ;;  %v316_v29 = vpop.xlane.xlu2 %315 }
 0x1af   :  { %300 = vadd.xlane.f32.xlu1 %v299_v14  ;;  %v969_v36 = vpop.xlane.xlu2 %335 }
 0x1b0   :  { %v348_v46 = vsub.f32 %v969_v36, %v904_v37  ;;  %vm389_vm4 = vcmp.ge.f32.partialorder %v969_v36, %v904_v37 }
 0x1b1   :  { %vm391_vm8 = vmand %vm985_vm5, %vm389_vm4 }
 0x1b7   :  { %318 = vadd.xlane.f32.xlu1 %v317_v18  ;;  %v344_v49 = vpop.xlane.xlu2 %343 }
 0x1b8   :  { %v352_v52 = vsub.f32 %v344_v49, %v908_v41 }
 0x1bf   :  { %338 = vadd.xlane.f32.xlu1 %v337_v20 }
 0x20a   :  { %v955_v25 = vpop.xlane.xlu0 %263 }
 0x20b   :  { %v284_v26 = vsub.f32 %v254_v59, %v955_v25 }
 0x20d   :  { %v286_v27 = vmul.f32 1.442695, %v284_v26 }
 0x20f   :  { %615 = vpow2.f32 %v286_v27 }
 0x212   :  { %v958_v28 = vpop.xlane.xlu1 %266  ;;  %v347_v59 = vpop.xlane.xlu0 %346 }
 0x213   :  { %v285_v31 = vsub.f32 %v255_v3, %v958_v28  ;;  %v353_v11 = vsub.f32 %v347_v59, %v941_v6 }
 0x215   :  { %v961_v32 = vpop.eup %615  ;;  %v288_v17 = vmul.f32 1.442695, %v285_v31 }
 0x216   :  { %v308_v23 = vsel %vm154_vm0, %v961_v32, 0.0 }
 0x217   :  { %617 = vpow2.f32 %v288_v17  ;;  %309 = vadd.xlane.f32.xlu2 %v308_v23 }
 0x218   :  { %619 = vlog2.f32 %v298_v24 }
 0x219   :  { %621 = vlog2.f32 %v316_v29 }
 0x21a   :  { %v965_v30 = vpop.xlane.xlu1 %306 }
 0x21b   :  { %vm425_vm11 = vweird.f32 %v965_v30 }
 0x21d   :  { %v967_v35 = vpop.eup %617 }
 0x21e   :  { %v311_v39 = vsel %vm154_vm0, %v967_v35, 0.0  ;;  %v620_v40 = vpop.eup %619 }
 0x21f   :  { %403 = vadd.xlane.f32.xlu2 %v402_v38  ;;  %312 = vadd.xlane.f32.xlu1 %v311_v39  ;;  %v321_v45 = vmul.f32 0.6931472, %v620_v40  ;;  %v622_v48 = vpop.eup %621  ;;  %v1014_v40 = vsel %vm985_vm5, 1.0, %v781_v21 }
 0x220   :  { %v978_v51 = vmul.f32 0.6931472, %v622_v48 }
 0x221   :  { %v350_v50 = vsub.f32 %v348_v46, %v321_v45 }
 0x222   :  { %v301_v42 = vpop.xlane.xlu1 %300  ;;  %v354_v58 = vsub.f32 %v352_v52, %v978_v51 }
 0x223   :  { %623 = vlog2.f32 %v301_v42  ;;  %v454_v57 = vmul.f32 1.442695, %v350_v50  ;;  %v373_v1 = vsub.f32 0.0, %v350_v50 }
 0x224   :  { %v356_v2 = vsub.f32 0.0, %v354_v58 }
 0x225   :  { %v375_v19 = vmul.f32 %v567_v5, %v373_v1 }
 0x226   :  { %v358_v12 = vmul.f32 %v567_v5, %v356_v2 }
 0x227   :  { %400 = vadd.xlane.f32.xlu1 %v399_v47  ;;  %v377_v17 = vsel %vm360_vm9, %v375_v19, 0.0 }
 0x228   :  { %v361_v26 = vsel %vm360_vm9, %v358_v12, 0.0 }
 0x229   :  { %v624_v60 = vpop.eup %623 }
 0x22a   :  { %v319_v53 = vpop.xlane.xlu1 %318  ;;  %v323_v3 = vmul.f32 0.6931472, %v624_v60 }
 0x22b   :  { %625 = vlog2.f32 %v319_v53 }
 0x22c   :  { %627 = vpow2.f32 %v454_v57 }
 0x231   :  { %v626_v62 = vpop.eup %625 }
 0x232   :  { %v998_v63 = vmul.f32 0.6931472, %v626_v62  ;;  %v1000_v0 = vpop.xlane.xlu1 %338  ;;  %v628_v14 = vpop.eup %627  ;;  %v431_v62 = vand.u32 2147483648, %v965_v30 }
 0x233   :  { %v349_v4 = vsub.f32 %v1000_v0, %v927_v54  ;;  %v577_v29 = vadd.f32 -0.9, %v628_v14  ;;  %vm390_vm3 = vcmp.ge.f32.partialorder %v1000_v0, %v927_v54 }
 0x234   :  { %v355_v7 = vsub.f32 %v353_v11, %v998_v63  ;;  %v429_v11 = vand.u32 2147483647, %v965_v30  ;;  %vm392_vm6 = vmand %vm991_vm7, %vm390_vm3 }
 0x235   :  { %v351_v9 = vsub.f32 %v349_v4, %v323_v3  ;;  %v460_v38 = vand.u32 2147483647, %v577_v29  ;;  %v416_v4 = vand.u32 2147483648, %v953_v22  ;;  %v576_v0 = vsel %vm392_vm6, 1.0, %v781_v21 }
 0x236   :  { %v357_v10 = vsub.f32 0.0, %v355_v7  ;;  %v432_v7 = vor.u32 1.1754944e-38, %v431_v62  ;;  %vm430_vm15 = vcmp.eq.f32.partialorder %v429_v11, 8.507059e+37 }
 0x237   :  { %v374_v15 = vsub.f32 0.0, %v351_v9  ;;  %v456_v18 = vmul.f32 1.442695, %v351_v9  ;;  %v462_v46 = vmul.f32 %v1014_v40, %v460_v38  ;;  %v414_v9 = vand.u32 2147483647, %v953_v22 }
 0x238   :  { %v359_v20 = vmul.f32 %v568_v8, %v357_v10  ;;  %v417_v12 = vor.u32 1.1754944e-38, %v416_v4 }
 0x239   :  { %629 = vpow2.f32 %v456_v18  ;;  %v376_v24 = vmul.f32 %v568_v8, %v374_v15  ;;  %v464_v48 = vsel %vm360_vm9, %v462_v46, 0.0  ;;  %vm415_vm2 = vcmp.eq.f32.partialorder %v414_v9, 8.507059e+37 }
 0x23a   :  { %v362_v27 = vsel %vm360_vm9, %v359_v20, 0.0  ;;  %631 = vrcp.f32 %v965_v30 }
 0x23b   :  { %v363_v31 = vadd.f32 %v362_v27, %v361_v26  ;;  %v378_v23 = vsel %vm360_vm9, %v376_v24, 0.0  ;;  %633 = vrcp.f32 %v953_v22 }
 0x23c   :  { %v379_v34 = vadd.f32 %v378_v23, %v377_v17 }
 0x23d   :  { %364 = vadd.xlane.f32.xlu0 %v363_v31 }
 0x23e   :  { %380 = vadd.xlane.f32.xlu1 %v379_v34 }
 0x23f   :  { %v630_v39 = vpop.eup %629 }
 0x240   :  { %v578_v42 = vadd.f32 -0.9, %v630_v39  ;;  %v632_v52 = vpop.eup %631 }
 0x241   :  { %v421_v53 = vmul.f32 %v632_v52, %v965_v30  ;;  %v634_v55 = vpop.eup %633  ;;  %vm426_vm10 = vweird.f32 %v632_v52 }
 0x242   :  { %v461_v45 = vand.u32 2147483647, %v578_v42  ;;  %v406_v56 = vmul.f32 %v634_v55, %v953_v22  ;;  %vm427_vm12 = vmor %vm425_vm11, %vm426_vm10  ;;  %vm411_vm14 = vweird.f32 %v634_v55 }
 0x243   :  { %v422_v43 = vsub.f32 1.0, %v421_v53  ;;  %vm412_vm1 = vmor %vm410_vm13, %vm411_vm14 }
 0x244   :  { %v463_v47 = vmul.f32 %v1019_v44, %v461_v45  ;;  %v407_v59 = vsub.f32 1.0, %v406_v56 }
 0x245   :  { %v423_v58 = vmul.f32 %v632_v52, %v422_v43 }
 0x246   :  { %v465_v49 = vsel %vm360_vm9, %v463_v47, 0.0  ;;  %v408_v2 = vmul.f32 %v634_v55, %v407_v59 }
 0x247   :  { %v466_v50 = vadd.f32 %v465_v49, %v464_v48  ;;  %v424_v60 = vadd.f32 %v632_v52, %v423_v58 }
 0x248   :  { %v409_v8 = vadd.f32 %v634_v55, %v408_v2 }
 0x249   :  { %467 = vadd.xlane.f32.xlu0 %v466_v50  ;;  %v428_v1 = vsel %vm427_vm12, %v632_v52, %v424_v60 }
 0x24a   :  { %v433_v30 = vsel %vm430_vm15, %v432_v7, %v428_v1  ;;  %v413_v14 = vsel %vm412_vm1, %v634_v55, %v409_v8 }
 0x24b   :  { %v418_v20 = vsel %vm415_vm2, %v417_v12, %v413_v14 }
 0x28a   :  { %v1029_v57 = vpop.xlane.xlu2 %309 }
 0x292   :  { %v1035_v3 = vpop.xlane.xlu1 %312  ;;  %v404_v5 = vpop.xlane.xlu2 %403 }
 0x293   :  { %635 = vlog2.f32 %v1035_v3  ;;  %v434_v10 = vmul.f32 %v433_v30, %v404_v5 }
 0x294   :  { %637 = vlog2.f32 %v1029_v57 }
 0x295   :  { %v436_v19 = vsub.f32 %v434_v10, %v958_v28  ;;  %v575_v28 = vsel %vm391_vm8, 1.0, %v781_v21 }
 0x299   :  { %v636_v15 = vpop.eup %635 }
 0x29a   :  { %v638_v18 = vpop.eup %637  ;;  %v327_v22 = vmul.f32 0.6931472, %v636_v15  ;;  %v401_v24 = vpop.xlane.xlu1 %400 }
 0x29b   :  { %v419_v26 = vmul.f32 %v418_v20, %v401_v24  ;;  %v325_v29 = vmul.f32 0.6931472, %v638_v18 }
 0x29c   :  { %v438_v27 = vsub.f32 %v436_v19, %v327_v22 }
 0x29d   :  { %v435_v54 = vsub.f32 %v419_v26, %v955_v25 }
 0x29e   :  { %v440_v37 = vmul.f32 %v576_v0, %v438_v27 }
 0x29f   :  { %v437_v31 = vsub.f32 %v435_v54, %v325_v29 }
 0x2a0   :  { %v442_v16 = vsel %vm360_vm9, %v440_v37, 0.0 }
 0x2a1   :  { %v439_v36 = vmul.f32 %v575_v28, %v437_v31 }
 0x2a3   :  { %v441_v17 = vsel %vm360_vm9, %v439_v36, 0.0 }
 0x2a4   :  { %v443_v23 = vadd.f32 %v442_v16, %v441_v17 }
 0x2a6   :  { %444 = vadd.xlane.f32.xlu2 %v443_v23 }
 0x2b0   :  { %v365_v34 = vpop.xlane.xlu0 %364 }
 0x2b1   :  { %v366_v38 = vrot.slane %v365_v34, 4  ;;  %v381_v61 = vpop.xlane.xlu1 %380 }
 0x2b2   :  { %v382_v39 = vrot.slane %v381_v61, 4 }
 0x2b3   :  { %v367_v42 = vadd.f32 %v366_v38, %v365_v34 }
 0x2b4   :  { %v383_v45 = vadd.f32 %v382_v39, %v381_v61 }
 0x2b5   :  { %v368_v25 = vrot.slane %v367_v42, 2 }
 0x2b6   :  { %v384_v46 = vrot.slane %v383_v45, 2 }
 0x2b7   :  { %v369_v47 = vadd.f32 %v368_v25, %v367_v42 }
 0x2b8   :  { %v385_v48 = vadd.f32 %v384_v46, %v383_v45 }
 0x2b9   :  { %v370_v49 = vrot.slane %v369_v47, 1 }
 0x2ba   :  { %v386_v50 = vrot.slane %v385_v48, 1 }
 0x2bb   :  { %v371_v21 = vadd.f32 %v370_v49, %v369_v47 }
 0x2bc   :  { %v387_v52 = vadd.f32 %v386_v50, %v385_v48  ;;  %v468_v53 = vpop.xlane.xlu0 %467 }
 0x2bd   :  { %584 = vpush %v371_v21  ;;  %v469_v55 = vrot.slane %v468_v53, 4 }
 0x2be   :  { %586 = vpush %v387_v52 }
 0x2bf   :  { %v470_v43 = vadd.f32 %v469_v55, %v468_v53 }
 0x2c1   :  { %v471_v56 = vrot.slane %v470_v43, 2 }
 0x2c3   :  { %v472_v62 = vadd.f32 %v471_v56, %v470_v43 }
 0x2c5   :  { %v473_v1 = vrot.slane %v472_v62, 1 }
 0x2c7   :  { %v474_v7 = vadd.f32 %v473_v1, %v472_v62 }
 0x2ee   :  { %s585_s0 = spop %584 }
 0x2ef   :  { %s587_s19 = spop %586 }
 0x2f0   :  { %s476_s20 = sadd.f32 %s587_s19, %s585_s0 }
 0x319   :  { %v445_v58 = vpop.xlane.xlu2 %444 }
 0x31a   :  { %v446_v59 = vrot.slane %v445_v58, 4 }
 0x31c   :  { %v447_v60 = vadd.f32 %v446_v59, %v445_v58 }
 0x31e   :  { %v448_v2 = vrot.slane %v447_v60, 2 }
 0x320   :  { %v449_v11 = vadd.f32 %v448_v2, %v447_v60 }
 0x322   :  { %v450_v4 = vrot.slane %v449_v11, 1 }
 0x324   :  { %v451_v5 = vadd.f32 %v450_v4, %v449_v11 }
 0x326   :  { %588 = vpush %v451_v5 }
 0x327   :  { %590 = vpush %v474_v7 }
 0x357   :  { %s589_s21 = spop %588 }
 0x358   :  { %s453_s22 = ssub.f32 0.0, %s589_s21  ;;  %s591_s24 = spop %590 }
 0x35a   :  { %s477_s23 = sadd.f32 %s476_s20, %s453_s22  ;;  %484 = sbr.rel (%p579_p0) target bundleno = 1182 (0x49e), region = 53 }
 0x35c   :  { %s478_s25 = sadd.f32 %s591_s24, %s477_s23 }
 0x35e   :  { %480 = sst [smem:[#allocation12]] %s478_s25 }
 0x35f   :  { %v485_v8 = vmul.f32 %v961_v32, %v870_v13  ;;  %v486_v30 = vmul.f32 %v967_v35, %v899_v33  ;;  %639 = vrcp.f32 %v1029_v57  ;;  %vm498_vm5 = vweird.f32 %v1029_v57  ;;  %s527_s26 = sld [smem:[#allocation12]] }
 0x360   :  { %641 = vrcp.f32 %v1035_v3  ;;  %v504_v33 = vand.u32 2147483648, %v1029_v57  ;;  %v502_v35 = vand.u32 2147483647, %v1029_v57  ;;  %vm513_vm11 = vweird.f32 %v1035_v3 }
 0x361   :  { %v487_v9 = vsel %vm154_vm0, %v485_v8, 0.0  ;;  %v490_v10 = vsel %vm154_vm0, %v486_v30, 0.0  ;;  %v519_v29 = vand.u32 2147483648, %v1035_v3  ;;  %v517_v0 = vand.u32 2147483647, %v1035_v3 }
 0x362   :  { %488 = vadd.xlane.f32.xlu0 %v487_v9  ;;  %v505_v20 = vor.u32 1.1754944e-38, %v504_v33  ;;  %vm503_vm10 = vcmp.eq.f32.partialorder %v502_v35, 8.507059e+37 }
 0x363   :  { %v520_v28 = vor.u32 1.1754944e-38, %v519_v29  ;;  %vm518_vm14 = vcmp.eq.f32.partialorder %v517_v0, 8.507059e+37 }
 0x365   :  { %v640_v12 = vpop.eup %639 }
 0x366   :  { %v494_v14 = vmul.f32 %v640_v12, %v1029_v57  ;;  %v642_v18 = vpop.eup %641  ;;  %vm499_vm7 = vweird.f32 %v640_v12 }
 0x367   :  { %v509_v13 = vmul.f32 %v642_v18, %v1035_v3  ;;  %vm500_vm0 = vmor %vm498_vm5, %vm499_vm7  ;;  %vm514_vm12 = vweird.f32 %v642_v18 }
 0x368   :  { %v495_v15 = vsub.f32 1.0, %v494_v14  ;;  %vm515_vm13 = vmor %vm513_vm11, %vm514_vm12 }
 0x369   :  { %v510_v22 = vsub.f32 1.0, %v509_v13 }
 0x36a   :  { %491 = vadd.xlane.f32.xlu0 %v490_v10  ;;  %v496_v19 = vmul.f32 %v640_v12, %v495_v15 }
 0x36b   :  { %v511_v26 = vmul.f32 %v642_v18, %v510_v22 }
 0x36c   :  { %v497_v32 = vadd.f32 %v640_v12, %v496_v19 }
 0x36d   :  { %v512_v54 = vadd.f32 %v642_v18, %v511_v26 }
 0x36e   :  { %v501_v24 = vsel %vm500_vm0, %v640_v12, %v497_v32 }
 0x36f   :  { %v506_v27 = vsel %vm503_vm10, %v505_v20, %v501_v24  ;;  %v516_v57 = vsel %vm515_vm13, %v642_v18, %v512_v54 }
 0x370   :  { %v521_v17 = vsel %vm518_vm14, %v520_v28, %v516_v57 }
 0x3d5   :  { %v489_v31 = vpop.xlane.xlu0 %488 }
 0x3d6   :  { %v507_v37 = vmul.f32 %v506_v27, %v489_v31 }
 0x3d8   :  { %v523_v36 = vsub.f32 %v507_v37, %v908_v41 }
 0x3da   :  { %v525_v23 = vsub.f32 %v523_v36, %v978_v51 }
 0x3dc   :  { %v528_v39 = vmul.f32 %v1014_v40, %v525_v23 }
 0x3dd   :  { %v492_v16 = vpop.xlane.xlu0 %491 }
 0x3de   :  { %v522_v34 = vmul.f32 %v521_v17, %v492_v16  ;;  %v530_v42 = vsel %vm360_vm9, %v528_v39, 0.0 }
 0x3e0   :  { %v524_v38 = vsub.f32 %v522_v34, %v941_v6 }
 0x3e2   :  { %v526_v61 = vsub.f32 %v524_v38, %v998_v63 }
 0x3e4   :  { %v529_v3 = vmul.f32 %v1019_v44, %v526_v61 }
 0x3e6   :  { %v531_v45 = vsel %vm360_vm9, %v529_v3, 0.0 }
 0x3e7   :  { %v532_v25 = vadd.f32 %v531_v45, %v530_v42 }
 0x3e9   :  { %533 = vadd.xlane.f32.xlu1 %v532_v25 }
 0x45c   :  { %v534_v41 = vpop.xlane.xlu1 %533 }
 0x45d   :  { %v535_v46 = vrot.slane %v534_v41, 4 }
 0x45f   :  { %v536_v47 = vadd.f32 %v535_v46, %v534_v41 }
 0x461   :  { %v537_v48 = vrot.slane %v536_v47, 2 }
 0x463   :  { %v538_v51 = vadd.f32 %v537_v48, %v536_v47 }
 0x465   :  { %v539_v49 = vrot.slane %v538_v51, 1 }
 0x467   :  { %v540_v50 = vadd.f32 %v539_v49, %v538_v51 }
 0x469   :  { %592 = vpush %v540_v50 }
 0x49a   :  { %s593_s3 = spop %592 }
 0x49b   :  { %s542_s27 = ssub.f32 %s527_s26, %s593_s3 }
 0x49d   :  { %543 = sst [smem:[#allocation12]] %s542_s27 }
 0x49e PF:  { %s549_s30 = sshll.u32 %s1092_s9, 4  ;;  %s782_s2 = smov [#allocation12]   ;;  %s550_s30 = int_to_ptr.hbm [resolvable:$true] %s549_s30 }
 0x49f   :  { %552 = dma.smem_to_hbm %s782_s2, 16, %s550_s30, [#allocation6]  }
 0x4a0   :  { %771 = dma.done.wait [#allocation6], 16  }
 0x4a1   :  { %772 = vsyncadd [#allocation6], 4294967280 }
 0x4a2   :  { %557 = sfence }
 0x4a3   :  { %558 = vsyncpa [#allocation5], 1 }
 0x4a4   :  { %559 = vsyncpa [#allocation8], 1 }
 0x4a5   :  { %560 = vsyncpa [#allocation11], 1 }
 0x4a6   :  { %561 = vsyncpa [#allocation6], 1 }

</bundles_post_ra>
